<compile_context>
chip_gen: v6e
topology: v6e:2x2x1
jax: 0.10.0
libtpu: 0.0.40
codegen_flags: <defaults>
</compile_context>

<pallas_src>
import functools

import jax
import jax.numpy as jnp
from jax.experimental import pallas as pl
from jax.experimental.pallas import tpu as pltpu


def _mha_kernel(q_ref, k_ref, v_ref, wq_ref, wk_ref, wv_ref, wo_ref, bo_ref,
                o_ref, *, heads, dim_head, scale):
    f32 = jnp.float32
    TB, N, dim = q_ref.shape
    inner = heads * dim_head

    # ---- input projections: three wide 2-D matmuls (best MXU fill) -------
    q2 = q_ref[...].astype(f32).reshape(TB * N, dim)
    k2 = k_ref[...].astype(f32).reshape(TB * N, dim)
    v2 = v_ref[...].astype(f32).reshape(TB * N, dim)

    qp = jnp.dot(q2, wq_ref[...].astype(f32), preferred_element_type=f32)
    kp = jnp.dot(k2, wk_ref[...].astype(f32), preferred_element_type=f32)
    vp = jnp.dot(v2, wv_ref[...].astype(f32), preferred_element_type=f32)

    # Fold softmax scale into q once (cheaper than scaling [N, N] logits
    # per head inside the loop).
    qp = qp * scale

    qp = qp.reshape(TB, N, inner)
    kp = kp.reshape(TB, N, inner)
    vp = vp.reshape(TB, N, inner)

    # ---- per-head attention (static unroll, lane slices at dh offsets) ---
    head_outs = []
    for h in range(heads):
        lo = h * dim_head
        hi = lo + dim_head
        qh = qp[..., lo:hi]                         # [TB, N, dh]
        kh = kp[..., lo:hi]
        vh = vp[..., lo:hi]

        dots = jnp.einsum('bid,bjd->bij', qh, kh,
                          preferred_element_type=f32)           # [TB, N, N]
        dots = dots - jnp.max(dots, axis=-1, keepdims=True)     # stable softmax
        e = jnp.exp(dots)
        attn = e / jnp.sum(e, axis=-1, keepdims=True)

        head_outs.append(jnp.einsum('bij,bjd->bid', attn, vh,
                                    preferred_element_type=f32))  # [TB, N, dh]

    # ---- merge heads & single wide output projection + bias --------------
    out = jnp.concatenate(head_outs, axis=-1)       # [TB, N, inner]
    out = out.reshape(TB * N, inner)
    out = jnp.dot(out, wo_ref[...].astype(f32), preferred_element_type=f32)
    out = out + bo_ref[...].astype(f32)             # [TB*N, dim] + [1, dim]

    # TODO(synk): nn.Dropout(p=dropout) is omitted (p=0.0 / eval => identity).
    o_ref[...] = out.reshape(o_ref.shape).astype(o_ref.dtype)


def multi_h_atten_forward(q, k, v, params, *, heads=8, dim_head=64,
                          batch_tile=1):
    """q, k, v: [B, N, dim].  Weights stored as [in, out] (transpose of
    PyTorch's nn.Linear [out, in])."""
    B, N, dim = q.shape
    inner = heads * dim_head
    assert params["wq"].shape == (dim, inner)
    assert params["wk"].shape == (dim, inner)
    assert params["wv"].shape == (dim, inner)
    assert params["wo"].shape == (inner, dim)
    assert B % batch_tile == 0, "pad B or pick batch_tile dividing B"
    TB = batch_tile
    scale = float(dim_head) ** -0.5

    kernel = functools.partial(_mha_kernel, heads=heads, dim_head=dim_head,
                               scale=scale)

    # q/k/v and output are tiled over batch; weights/bias stay resident
    # (constant index_map -> no per-step re-DMA).
    qkv_spec = pl.BlockSpec((TB, N, dim), lambda b: (b, 0, 0))
    w_in_spec = pl.BlockSpec((dim, inner), lambda b: (0, 0))
    w_out_spec = pl.BlockSpec((inner, dim), lambda b: (0, 0))
    bias_spec = pl.BlockSpec((1, dim), lambda b: (0, 0))
    out_spec = pl.BlockSpec((TB, N, dim), lambda b: (b, 0, 0))

    bo = params["bo"].reshape(1, dim)

    return pl.pallas_call(
        kernel,
        out_shape=jax.ShapeDtypeStruct((B, N, dim), q.dtype),
        grid_spec=pltpu.PrefetchScalarGridSpec(
            num_scalar_prefetch=0,
            grid=(B // TB,),
            in_specs=[qkv_spec, qkv_spec, qkv_spec,
                      w_in_spec, w_in_spec, w_in_spec,
                      w_out_spec, bias_spec],
            out_specs=out_spec,
        ),
        compiler_params=pltpu.CompilerParams(
            dimension_semantics=("parallel",)),
    )(q, k, v, params["wq"], params["wk"], params["wv"], params["wo"], bo)


def init_params(key, dim, heads, dim_head):
    """nn.Linear-style init; weights stored as [in, out]."""
    inner = heads * dim_head

    def linear(k, fan_in, fan_out, bias):
        kw, kb = jax.random.split(k)
        bound = 1.0 / jnp.sqrt(fan_in)
        w = jax.random.uniform(kw, (fan_in, fan_out), jnp.float32,
                               -bound, bound)
        b = (jax.random.uniform(kb, (fan_out,), jnp.float32, -bound, bound)
             if bias else None)
        return w, b

    kq, kk, kv, ko = jax.random.split(key, 4)
    wq, _ = linear(kq, dim, inner, bias=False)
    wk, _ = linear(kk, dim, inner, bias=False)
    wv, _ = linear(kv, dim, inner, bias=False)
    wo, bo = linear(ko, inner, dim, bias=True)
    return {"wq": wq, "wk": wk, "wv": wv, "wo": wo, "bo": bo}


def _reference(q, k, v, p, heads, dim_head):
    """Pure-JAX reference mirroring the PyTorch forward."""
    B, N, _ = q.shape
    scale = float(dim_head) ** -0.5

    def split(t):
        return t.reshape(B, N, heads, dim_head).transpose(0, 2, 1, 3)

    qh = split(q @ p["wq"])
    kh = split(k @ p["wk"])
    vh = split(v @ p["wv"])
    dots = jnp.einsum('bhid,bhjd->bhij', qh, kh) * scale
    attn = jax.nn.softmax(dots, axis=-1)
    out = jnp.einsum('bhij,bhjd->bhid', attn, vh)
    out = out.transpose(0, 2, 1, 3).reshape(B, N, heads * dim_head)
    return out @ p["wo"] + p["bo"]


if __name__ == "__main__":
    key = jax.random.PRNGKey(0)
    kq, kk, kv, kp = jax.random.split(key, 4)

    B, N, dim = 2, 8, 32
    heads, dim_head = 4, 16          # inner_dim = 64; project_out=True path

    q = jax.random.normal(kq, (B, N, dim), jnp.float32)
    k = jax.random.normal(kk, (B, N, dim), jnp.float32)
    v = jax.random.normal(kv, (B, N, dim), jnp.float32)
    params = init_params(kp, dim, heads, dim_head)

    out = multi_h_atten_forward(q, k, v, params, heads=heads,
                                dim_head=dim_head, batch_tile=1)
    out = jax.block_until_ready(out)

    ref = _reference(q, k, v, params, heads, dim_head)
    assert out.shape == (B, N, dim)
    assert jnp.allclose(out, ref, atol=1e-4, rtol=1e-4), (out, ref)

    print("KERNEL_OK")
</pallas_src>

<mosaic_0001>
module attributes {stable_mosaic.version = 11 : i64} {
  func.func @_mha_kernel(%arg0: i32, %arg1: memref<1x8x32xf32, #tpu.memory_space<vmem>>, %arg2: memref<1x8x32xf32, #tpu.memory_space<vmem>>, %arg3: memref<1x8x32xf32, #tpu.memory_space<vmem>>, %arg4: memref<32x64xf32, #tpu.memory_space<vmem>>, %arg5: memref<32x64xf32, #tpu.memory_space<vmem>>, %arg6: memref<32x64xf32, #tpu.memory_space<vmem>>, %arg7: memref<64x32xf32, #tpu.memory_space<vmem>>, %arg8: memref<1x32xf32, #tpu.memory_space<vmem>>, %arg9: memref<1x8x32xf32, #tpu.memory_space<vmem>>) attributes {dimension_semantics = [#tpu.dimension_semantics<parallel>], iteration_bounds = array<i64: 2>, scalar_prefetch = 0 : i64, scratch_operands = 0 : i64, tpu.core_type = #tpu.core_type<tc>, window_params = [{transform_indices = @transform_0, window_bounds = array<i64: 1, 8, 32>}, {transform_indices = @transform_1, window_bounds = array<i64: 1, 8, 32>}, {transform_indices = @transform_2, window_bounds = array<i64: 1, 8, 32>}, {pipeline_mode = #tpu.pipeline_mode<synchronous>, transform_indices = @transform_3, window_bounds = array<i64: 32, 64>}, {pipeline_mode = #tpu.pipeline_mode<synchronous>, transform_indices = @transform_4, window_bounds = array<i64: 32, 64>}, {pipeline_mode = #tpu.pipeline_mode<synchronous>, transform_indices = @transform_5, window_bounds = array<i64: 32, 64>}, {pipeline_mode = #tpu.pipeline_mode<synchronous>, transform_indices = @transform_6, window_bounds = array<i64: 64, 32>}, {pipeline_mode = #tpu.pipeline_mode<synchronous>, transform_indices = @transform_7, window_bounds = array<i64: 1, 32>}, {transform_indices = @transform_8, window_bounds = array<i64: 1, 8, 32>}]} {
    %c0 = arith.constant 0 : index
    %c0_0 = arith.constant 0 : index
    %c0_1 = arith.constant 0 : index
    %0 = vector.load %arg1[%c0, %c0_0, %c0_1] : memref<1x8x32xf32, #tpu.memory_space<vmem>>, vector<1x8x32xf32>
    %1 = vector.shape_cast %0 : vector<1x8x32xf32> to vector<8x32xf32>
    %c0_2 = arith.constant 0 : index
    %c0_3 = arith.constant 0 : index
    %c0_4 = arith.constant 0 : index
    %2 = vector.load %arg2[%c0_2, %c0_3, %c0_4] : memref<1x8x32xf32, #tpu.memory_space<vmem>>, vector<1x8x32xf32>
    %3 = vector.shape_cast %2 : vector<1x8x32xf32> to vector<8x32xf32>
    %c0_5 = arith.constant 0 : index
    %c0_6 = arith.constant 0 : index
    %c0_7 = arith.constant 0 : index
    %4 = vector.load %arg3[%c0_5, %c0_6, %c0_7] : memref<1x8x32xf32, #tpu.memory_space<vmem>>, vector<1x8x32xf32>
    %5 = vector.shape_cast %4 : vector<1x8x32xf32> to vector<8x32xf32>
    %c0_8 = arith.constant 0 : index
    %c0_9 = arith.constant 0 : index
    %6 = vector.load %arg4[%c0_8, %c0_9] : memref<32x64xf32, #tpu.memory_space<vmem>>, vector<32x64xf32>
    %cst = arith.constant dense<0.000000e+00> : vector<8x64xf32>
    %7 = tpu.matmul %1, %6, %cst {dimension_numbers = #tpu.dot_dimension_numbers<[1], [0], [0], [1], [0, 0, 1, 1], [], []>} : vector<8x32xf32>, vector<32x64xf32>, vector<8x64xf32> -> vector<8x64xf32>
    %c0_10 = arith.constant 0 : index
    %c0_11 = arith.constant 0 : index
    %8 = vector.load %arg5[%c0_10, %c0_11] : memref<32x64xf32, #tpu.memory_space<vmem>>, vector<32x64xf32>
    %cst_12 = arith.constant dense<0.000000e+00> : vector<8x64xf32>
    %9 = tpu.matmul %3, %8, %cst_12 {dimension_numbers = #tpu.dot_dimension_numbers<[1], [0], [0], [1], [0, 0, 1, 1], [], []>} : vector<8x32xf32>, vector<32x64xf32>, vector<8x64xf32> -> vector<8x64xf32>
    %c0_13 = arith.constant 0 : index
    %c0_14 = arith.constant 0 : index
    %10 = vector.load %arg6[%c0_13, %c0_14] : memref<32x64xf32, #tpu.memory_space<vmem>>, vector<32x64xf32>
    %cst_15 = arith.constant dense<0.000000e+00> : vector<8x64xf32>
    %11 = tpu.matmul %5, %10, %cst_15 {dimension_numbers = #tpu.dot_dimension_numbers<[1], [0], [0], [1], [0, 0, 1, 1], [], []>} : vector<8x32xf32>, vector<32x64xf32>, vector<8x64xf32> -> vector<8x64xf32>
    %cst_16 = arith.constant 2.500000e-01 : f32
    %12 = vector.broadcast %cst_16 : f32 to vector<8x64xf32>
    %13 = arith.mulf %7, %12 : vector<8x64xf32>
    %14 = vector.shape_cast %13 : vector<8x64xf32> to vector<1x8x64xf32>
    %15 = vector.shape_cast %9 : vector<8x64xf32> to vector<1x8x64xf32>
    %16 = vector.shape_cast %11 : vector<8x64xf32> to vector<1x8x64xf32>
    %17 = vector.extract_strided_slice %14 {offsets = [0, 0, 0], sizes = [1, 8, 16], strides = [1, 1, 1]} : vector<1x8x64xf32> to vector<1x8x16xf32>
    %18 = vector.extract_strided_slice %15 {offsets = [0, 0, 0], sizes = [1, 8, 16], strides = [1, 1, 1]} : vector<1x8x64xf32> to vector<1x8x16xf32>
    %19 = vector.extract_strided_slice %16 {offsets = [0, 0, 0], sizes = [1, 8, 16], strides = [1, 1, 1]} : vector<1x8x64xf32> to vector<1x8x16xf32>
    "tpu.trace_start"() <{level = 10 : i32, message = "bid,bjd->bij"}> : () -> ()
    %cst_17 = arith.constant dense<0.000000e+00> : vector<1x8x8xf32>
    %20 = tpu.matmul %17, %18, %cst_17 {dimension_numbers = #tpu.dot_dimension_numbers<[2], [2], [1], [1], [0, 0, 0, 1, 1, 1], [0], [0]>} : vector<1x8x16xf32>, vector<1x8x16xf32>, vector<1x8x8xf32> -> vector<1x8x8xf32>
    "tpu.trace_stop"() : () -> ()
    %cst_18 = arith.constant dense<0xFF800000> : vector<1x8xf32>
    %21 = vector.multi_reduction <maximumf>, %20, %cst_18 [2] : vector<1x8x8xf32> to vector<1x8xf32>
    %22 = vector.shape_cast %21 : vector<1x8xf32> to vector<1x8x1xf32>
    %23 = vector.broadcast %22 : vector<1x8x1xf32> to vector<1x8x8xf32>
    %24 = arith.subf %20, %23 : vector<1x8x8xf32>
    %25 = math.exp %24 : vector<1x8x8xf32>
    %cst_19 = arith.constant dense<0.000000e+00> : vector<1x8xf32>
    %26 = vector.multi_reduction <add>, %25, %cst_19 [2] : vector<1x8x8xf32> to vector<1x8xf32>
    %27 = vector.shape_cast %26 : vector<1x8xf32> to vector<1x8x1xf32>
    %28 = vector.broadcast %27 : vector<1x8x1xf32> to vector<1x8x8xf32>
    %29 = arith.divf %25, %28 : vector<1x8x8xf32>
    "tpu.trace_start"() <{level = 10 : i32, message = "bij,bjd->bid"}> : () -> ()
    %cst_20 = arith.constant dense<0.000000e+00> : vector<1x8x16xf32>
    %30 = tpu.matmul %29, %19, %cst_20 {dimension_numbers = #tpu.dot_dimension_numbers<[2], [1], [1], [2], [0, 0, 0, 1, 1, 2], [0], [0]>} : vector<1x8x8xf32>, vector<1x8x16xf32>, vector<1x8x16xf32> -> vector<1x8x16xf32>
    "tpu.trace_stop"() : () -> ()
    %31 = vector.extract_strided_slice %14 {offsets = [0, 0, 16], sizes = [1, 8, 16], strides = [1, 1, 1]} : vector<1x8x64xf32> to vector<1x8x16xf32>
    %32 = vector.extract_strided_slice %15 {offsets = [0, 0, 16], sizes = [1, 8, 16], strides = [1, 1, 1]} : vector<1x8x64xf32> to vector<1x8x16xf32>
    %33 = vector.extract_strided_slice %16 {offsets = [0, 0, 16], sizes = [1, 8, 16], strides = [1, 1, 1]} : vector<1x8x64xf32> to vector<1x8x16xf32>
    "tpu.trace_start"() <{level = 10 : i32, message = "bid,bjd->bij"}> : () -> ()
    %cst_21 = arith.constant dense<0.000000e+00> : vector<1x8x8xf32>
    %34 = tpu.matmul %31, %32, %cst_21 {dimension_numbers = #tpu.dot_dimension_numbers<[2], [2], [1], [1], [0, 0, 0, 1, 1, 1], [0], [0]>} : vector<1x8x16xf32>, vector<1x8x16xf32>, vector<1x8x8xf32> -> vector<1x8x8xf32>
    "tpu.trace_stop"() : () -> ()
    %cst_22 = arith.constant dense<0xFF800000> : vector<1x8xf32>
    %35 = vector.multi_reduction <maximumf>, %34, %cst_22 [2] : vector<1x8x8xf32> to vector<1x8xf32>
    %36 = vector.shape_cast %35 : vector<1x8xf32> to vector<1x8x1xf32>
    %37 = vector.broadcast %36 : vector<1x8x1xf32> to vector<1x8x8xf32>
    %38 = arith.subf %34, %37 : vector<1x8x8xf32>
    %39 = math.exp %38 : vector<1x8x8xf32>
    %cst_23 = arith.constant dense<0.000000e+00> : vector<1x8xf32>
    %40 = vector.multi_reduction <add>, %39, %cst_23 [2] : vector<1x8x8xf32> to vector<1x8xf32>
    %41 = vector.shape_cast %40 : vector<1x8xf32> to vector<1x8x1xf32>
    %42 = vector.broadcast %41 : vector<1x8x1xf32> to vector<1x8x8xf32>
    %43 = arith.divf %39, %42 : vector<1x8x8xf32>
    "tpu.trace_start"() <{level = 10 : i32, message = "bij,bjd->bid"}> : () -> ()
    %cst_24 = arith.constant dense<0.000000e+00> : vector<1x8x16xf32>
    %44 = tpu.matmul %43, %33, %cst_24 {dimension_numbers = #tpu.dot_dimension_numbers<[2], [1], [1], [2], [0, 0, 0, 1, 1, 2], [0], [0]>} : vector<1x8x8xf32>, vector<1x8x16xf32>, vector<1x8x16xf32> -> vector<1x8x16xf32>
    "tpu.trace_stop"() : () -> ()
    %45 = vector.extract_strided_slice %14 {offsets = [0, 0, 32], sizes = [1, 8, 16], strides = [1, 1, 1]} : vector<1x8x64xf32> to vector<1x8x16xf32>
    %46 = vector.extract_strided_slice %15 {offsets = [0, 0, 32], sizes = [1, 8, 16], strides = [1, 1, 1]} : vector<1x8x64xf32> to vector<1x8x16xf32>
    %47 = vector.extract_strided_slice %16 {offsets = [0, 0, 32], sizes = [1, 8, 16], strides = [1, 1, 1]} : vector<1x8x64xf32> to vector<1x8x16xf32>
    "tpu.trace_start"() <{level = 10 : i32, message = "bid,bjd->bij"}> : () -> ()
    %cst_25 = arith.constant dense<0.000000e+00> : vector<1x8x8xf32>
    %48 = tpu.matmul %45, %46, %cst_25 {dimension_numbers = #tpu.dot_dimension_numbers<[2], [2], [1], [1], [0, 0, 0, 1, 1, 1], [0], [0]>} : vector<1x8x16xf32>, vector<1x8x16xf32>, vector<1x8x8xf32> -> vector<1x8x8xf32>
    "tpu.trace_stop"() : () -> ()
    %cst_26 = arith.constant dense<0xFF800000> : vector<1x8xf32>
    %49 = vector.multi_reduction <maximumf>, %48, %cst_26 [2] : vector<1x8x8xf32> to vector<1x8xf32>
    %50 = vector.shape_cast %49 : vector<1x8xf32> to vector<1x8x1xf32>
    %51 = vector.broadcast %50 : vector<1x8x1xf32> to vector<1x8x8xf32>
    %52 = arith.subf %48, %51 : vector<1x8x8xf32>
    %53 = math.exp %52 : vector<1x8x8xf32>
    %cst_27 = arith.constant dense<0.000000e+00> : vector<1x8xf32>
    %54 = vector.multi_reduction <add>, %53, %cst_27 [2] : vector<1x8x8xf32> to vector<1x8xf32>
    %55 = vector.shape_cast %54 : vector<1x8xf32> to vector<1x8x1xf32>
    %56 = vector.broadcast %55 : vector<1x8x1xf32> to vector<1x8x8xf32>
    %57 = arith.divf %53, %56 : vector<1x8x8xf32>
    "tpu.trace_start"() <{level = 10 : i32, message = "bij,bjd->bid"}> : () -> ()
    %cst_28 = arith.constant dense<0.000000e+00> : vector<1x8x16xf32>
    %58 = tpu.matmul %57, %47, %cst_28 {dimension_numbers = #tpu.dot_dimension_numbers<[2], [1], [1], [2], [0, 0, 0, 1, 1, 2], [0], [0]>} : vector<1x8x8xf32>, vector<1x8x16xf32>, vector<1x8x16xf32> -> vector<1x8x16xf32>
    "tpu.trace_stop"() : () -> ()
    %59 = vector.extract_strided_slice %14 {offsets = [0, 0, 48], sizes = [1, 8, 16], strides = [1, 1, 1]} : vector<1x8x64xf32> to vector<1x8x16xf32>
    %60 = vector.extract_strided_slice %15 {offsets = [0, 0, 48], sizes = [1, 8, 16], strides = [1, 1, 1]} : vector<1x8x64xf32> to vector<1x8x16xf32>
    %61 = vector.extract_strided_slice %16 {offsets = [0, 0, 48], sizes = [1, 8, 16], strides = [1, 1, 1]} : vector<1x8x64xf32> to vector<1x8x16xf32>
    "tpu.trace_start"() <{level = 10 : i32, message = "bid,bjd->bij"}> : () -> ()
    %cst_29 = arith.constant dense<0.000000e+00> : vector<1x8x8xf32>
    %62 = tpu.matmul %59, %60, %cst_29 {dimension_numbers = #tpu.dot_dimension_numbers<[2], [2], [1], [1], [0, 0, 0, 1, 1, 1], [0], [0]>} : vector<1x8x16xf32>, vector<1x8x16xf32>, vector<1x8x8xf32> -> vector<1x8x8xf32>
    "tpu.trace_stop"() : () -> ()
    %cst_30 = arith.constant dense<0xFF800000> : vector<1x8xf32>
    %63 = vector.multi_reduction <maximumf>, %62, %cst_30 [2] : vector<1x8x8xf32> to vector<1x8xf32>
    %64 = vector.shape_cast %63 : vector<1x8xf32> to vector<1x8x1xf32>
    %65 = vector.broadcast %64 : vector<1x8x1xf32> to vector<1x8x8xf32>
    %66 = arith.subf %62, %65 : vector<1x8x8xf32>
    %67 = math.exp %66 : vector<1x8x8xf32>
    %cst_31 = arith.constant dense<0.000000e+00> : vector<1x8xf32>
    %68 = vector.multi_reduction <add>, %67, %cst_31 [2] : vector<1x8x8xf32> to vector<1x8xf32>
    %69 = vector.shape_cast %68 : vector<1x8xf32> to vector<1x8x1xf32>
    %70 = vector.broadcast %69 : vector<1x8x1xf32> to vector<1x8x8xf32>
    %71 = arith.divf %67, %70 : vector<1x8x8xf32>
    "tpu.trace_start"() <{level = 10 : i32, message = "bij,bjd->bid"}> : () -> ()
    %cst_32 = arith.constant dense<0.000000e+00> : vector<1x8x16xf32>
    %72 = tpu.matmul %71, %61, %cst_32 {dimension_numbers = #tpu.dot_dimension_numbers<[2], [1], [1], [2], [0, 0, 0, 1, 1, 2], [0], [0]>} : vector<1x8x8xf32>, vector<1x8x16xf32>, vector<1x8x16xf32> -> vector<1x8x16xf32>
    "tpu.trace_stop"() : () -> ()
    %73 = tpu.concatenate %30, %44, %58, %72 in 2 : vector<1x8x16xf32>, vector<1x8x16xf32>, vector<1x8x16xf32>, vector<1x8x16xf32> -> vector<1x8x64xf32>
    %74 = vector.shape_cast %73 : vector<1x8x64xf32> to vector<8x64xf32>
    %c0_33 = arith.constant 0 : index
    %c0_34 = arith.constant 0 : index
    %75 = vector.load %arg7[%c0_33, %c0_34] : memref<64x32xf32, #tpu.memory_space<vmem>>, vector<64x32xf32>
    %cst_35 = arith.constant dense<0.000000e+00> : vector<8x32xf32>
    %76 = tpu.matmul %74, %75, %cst_35 {dimension_numbers = #tpu.dot_dimension_numbers<[1], [0], [0], [1], [0, 0, 1, 1], [], []>} : vector<8x64xf32>, vector<64x32xf32>, vector<8x32xf32> -> vector<8x32xf32>
    %c0_36 = arith.constant 0 : index
    %c0_37 = arith.constant 0 : index
    %77 = vector.load %arg8[%c0_36, %c0_37] : memref<1x32xf32, #tpu.memory_space<vmem>>, vector<1x32xf32>
    %78 = vector.broadcast %77 : vector<1x32xf32> to vector<8x32xf32>
    %79 = arith.addf %76, %78 : vector<8x32xf32>
    %80 = vector.shape_cast %79 : vector<8x32xf32> to vector<1x8x32xf32>
    %c0_38 = arith.constant 0 : index
    %c0_39 = arith.constant 0 : index
    %c0_40 = arith.constant 0 : index
    %81 = vector.load %arg9[%c0_38, %c0_39, %c0_40] : memref<1x8x32xf32, #tpu.memory_space<vmem>>, vector<1x8x32xf32>
    tpu.vector_store %arg9[%c0_38, %c0_39, %c0_40], %80 {strides = array<i32>} : memref<1x8x32xf32, #tpu.memory_space<vmem>>, vector<1x8x32xf32>,
    return
  }
  func.func @transform_0(%arg0: i32) -> (i32, i32, i32) {
    %c0_i32 = arith.constant 0 : i32
    %c0_i32_0 = arith.constant 0 : i32
    %c0_i32_1 = arith.constant 0 : i32
    return %arg0, %c0_i32, %c0_i32_0 : i32, i32, i32
  }
  func.func @transform_1(%arg0: i32) -> (i32, i32, i32) {
    %c0_i32 = arith.constant 0 : i32
    %c0_i32_0 = arith.constant 0 : i32
    %c0_i32_1 = arith.constant 0 : i32
    return %arg0, %c0_i32, %c0_i32_0 : i32, i32, i32
  }
  func.func @transform_2(%arg0: i32) -> (i32, i32, i32) {
    %c0_i32 = arith.constant 0 : i32
    %c0_i32_0 = arith.constant 0 : i32
    %c0_i32_1 = arith.constant 0 : i32
    return %arg0, %c0_i32, %c0_i32_0 : i32, i32, i32
  }
  func.func @transform_3(%arg0: i32) -> (i32, i32) {
    %c0_i32 = arith.constant 0 : i32
    %c0_i32_0 = arith.constant 0 : i32
    %c0_i32_1 = arith.constant 0 : i32
    return %c0_i32, %c0_i32_0 : i32, i32
  }
  func.func @transform_4(%arg0: i32) -> (i32, i32) {
    %c0_i32 = arith.constant 0 : i32
    %c0_i32_0 = arith.constant 0 : i32
    %c0_i32_1 = arith.constant 0 : i32
    return %c0_i32, %c0_i32_0 : i32, i32
  }
  func.func @transform_5(%arg0: i32) -> (i32, i32) {
    %c0_i32 = arith.constant 0 : i32
    %c0_i32_0 = arith.constant 0 : i32
    %c0_i32_1 = arith.constant 0 : i32
    return %c0_i32, %c0_i32_0 : i32, i32
  }
  func.func @transform_6(%arg0: i32) -> (i32, i32) {
    %c0_i32 = arith.constant 0 : i32
    %c0_i32_0 = arith.constant 0 : i32
    %c0_i32_1 = arith.constant 0 : i32
    return %c0_i32, %c0_i32_0 : i32, i32
  }
  func.func @transform_7(%arg0: i32) -> (i32, i32) {
    %c0_i32 = arith.constant 0 : i32
    %c0_i32_0 = arith.constant 0 : i32
    %c0_i32_1 = arith.constant 0 : i32
    return %c0_i32, %c0_i32_0 : i32, i32
  }
  func.func @transform_8(%arg0: i32) -> (i32, i32, i32) {
    %c0_i32 = arith.constant 0 : i32
    %c0_i32_0 = arith.constant 0 : i32
    %c0_i32_1 = arith.constant 0 : i32
    return %arg0, %c0_i32, %c0_i32_0 : i32, i32, i32
  }
}

</mosaic_0001>

<bundles_post_ra>
// kernel: tpu_custom_call.1
= control target key start
LH: loop header
LB: loop body
LE: loop exit
PB: predicated region body
PF: predicated region fallthrough
CT: control target
= control target key end

     0   :  { %s2348_s0 = inlined_call_operand.hbm [shape: f32[2,8,32], index: 0, kind: input, shape index: {}]   ;;  %s2349_s1 = inlined_call_operand.hbm [shape: f32[2,8,32], index: 1, kind: input, shape index: {}]   ;;  %s2350_s2 = inlined_call_operand.hbm [shape: f32[2,8,32], index: 2, kind: input, shape index: {}]   ;;  %s2351_s3 = inlined_call_operand.vmem [shape: f32[32,64], index: 3, kind: input, shape index: {}]   ;;  %s2352_s4 = inlined_call_operand.vmem [shape: f32[32,64], index: 4, kind: input, shape index: {}]   ;;  %s2353_s5 = inlined_call_operand.vmem [shape: f32[32,64], index: 5, kind: input, shape index: {}]   ;;  %s2354_s6 = inlined_call_operand.vmem [shape: f32[64,32], index: 6, kind: input, shape index: {}]   ;;  %s2355_s7 = inlined_call_operand.vmem [shape: f32[1,32], index: 7, kind: input, shape index: {}]   ;;  %s2356_s8 = inlined_call_operand.hbm [shape: f32[2,8,32], index: 8, kind: output, shape index: {}]  }
   0x1   :  { %2366 = sst [smem:[#allocation17_spill]] %s2348_s0 }
   0x2   :  { %2367 = sst [smem:[#allocation18_spill]] %s2349_s1 }
   0x3   :  { %2368 = sst [smem:[#allocation19_spill]] %s2356_s8 }
   0x4   :  { %13 = vsyncpa [#allocation3], 0 }
   0x5   :  { %15 = vsyncpa [#allocation3 + $0x1], 0 }
   0x6   :  { %16 = vsyncpa [#allocation6], 0 }
   0x7   :  { %18 = vsyncpa [#allocation6 + $0x1], 0 }
   0x8   :  { %19 = vsyncpa [#allocation4], 0 }
   0x9   :  { %21 = vsyncpa [#allocation4 + $0x1], 0  ;;  %s1977_s27 = smov 0   ;;  %s1979_s28 = smov 0  }
   0xa   :  { %s1981_s29 = smov 0   ;;  %s1983_s30 = smov 0  }
   0xb LB: > { %2369 = sst [smem:[#allocation12_spill]] %s1906_s27  ;;  %s1998_s9 = sadd.s32 4294967295, %s1918_s30   ;;  %s1918_s30 = sphi %s1983_s30, %s2392_s30   ;;  %s1914_s29 = sphi %s1981_s29, %s2394_s29   ;;  %s1910_s28 = sphi %s1979_s28, %s2396_s28   ;;  %s1906_s27 = sphi %s1977_s27, %s2395_s27  }
   0xc   : > { %2370 = sst [smem:[#allocation13_spill]] %s1914_s29  ;;  %s1519_s10 = sadd.s32 4294967294, %s1918_s30  }
   0xd   : > { %s2002_s11 = sadd.s32 1, %s1918_s30   ;;  %s34_s12 = sadd.s32 1, %s1914_s29 }
   0xe   : > { %2371 = sst [smem:[#allocation14_spill]] %s2002_s11  ;;  %s31_s13 = ssub.s32 %s1918_s30, %s2002_s11 }
   0xf   : > { %p41_p0 = scmp.ne.s32.totalorder %s1914_s29, %s1910_s28  ;;  %p32_p1 = scmp.eq.s32.totalorder %s31_s13, 0 }
  0x10   : > { %p42_p2 = scmp.eq.s32.totalorder %s1918_s30, 0  ;;  %p47_p3 = scmp.ne.s32.totalorder %s1910_s28, %s1906_s27 }
  0x11   : > { %p48_p4 = scmp.eq.s32.totalorder %s1998_s9, 0  ;;  %p228_p7 = scmp.eq.s32.totalorder %s1998_s9, 1 }
  0x12   : > { %s2014_s14 = scalar_select %p32_p1, %s1914_s29, %s34_s12  }
  0x13   : > { %p43_p5 = por %p42_p2, %p41_p0  ;;  %p2016_p6 = por %p48_p4, %p47_p3 }
  0x14   : > { %2372 = sst [smem:[#allocation15_spill]] %s2014_s14  ;;  %p234_p8 = scmp.eq.s32.totalorder %s1519_s10, 1 }
  0x15   : > { %s2373_s15 = scalar_select %p2016_p6, 1, 0 }
  0x16   : > { %p1708_p10 = scmp.lt.s32.totalorder %s1918_s30, 2  ;;  %p2023_p11 = por %p228_p7, %p41_p0 }
  0x17   : > { %p2027_p12 = por %p234_p8, %p47_p3  ;;  %s2357_s18 = sand.u32 1, %s1914_s29  }
  0x18   : > { %s2374_s16 = scalar_select %p2023_p11, 1, 0 }
  0x19   : > { %s2375_s17 = scalar_select %p2027_p12, 1, 0 }
  0x1a   : > { %s2033_s19 = sshll.u32 %s1918_s30, 7  ;;  %s2037_s20 = sshll.u32 %s2357_s18, 3 }
  0x1b   : > { %2376 = sst [smem:[#allocation16_spill]] %s2375_s17  ;;  %p2039_p13 = pnand %p1708_p10, %p43_p5 }
  0x1c   : > { %s287_s22 = sand.u32 1, %s1918_s30   ;;  %s2378_s1 = sld [smem:[#allocation18_spill]] }
  0x1d   : > { %s291_s26 = scalar_lea.vmem [#allocation5], %s2037_s20  ;;  %s2052_s12 = scalar_lea.sflag [#allocation6], %s287_s22 }
  0x1e   : > { %s298_s10 = sshll.u32 %s291_s26, 4  ;;  %p2058_p2 = pneg %p2039_p13  ;;  %s299_s10 = int_to_ptr.vmem [resolvable:$true] %s298_s10 }
  0x22   : > { %s2048_s25 = scalar_lea.hbm %s2378_s1, %s2033_s19  ;;  %s1771_s14 = scalar_lea.hbm %s2378_s1, 256 }
  0x23   : > { %s1766_s13 = scalar_lea.hbm %s2048_s25, 128  ;;  %p1772_p5 = scmp.lt.s32.totalorder %s2048_s25, %s2378_s1 }
  0x24   : > { %p1767_p1 = scmp.ne.s32.totalorder %s2048_s25, %s1766_s13  ;;  %p1773_p7 = scmp.lt.s32.totalorder %s1771_s14, %s1766_s13 }
  0x26   : > { %p1769_p3 = pnand %p2058_p2, %p1767_p1  ;;  %p1774_p8 = por %p1773_p7, %p1772_p5 }
  0x28   : > { %p1770_p4 = pneg %p1769_p3 }
  0x2a   : > { %p1775_p10 = pnand %p1774_p8, %p1770_p4 }
  0x2c   : > { %1778 = shalt.err (!%p1775_p10)
}
  0x2d   : > { %s1779_s22 = scalar_lea.vmem %s299_s10, 128  ;;  %s1920_s17 = smov [#allocation5]  }
  0x2e   : > { %p1780_p9 = scmp.ne.s32.totalorder %s299_s10, %s1779_s22  ;;  %s1784_s27 = sshll.u32 %s1920_s17, 4  ;;  %s1785_s27 = int_to_ptr.vmem [resolvable:$false] %s1784_s27 }
  0x2f   : > { %s1786_s8 = scalar_lea.vmem %s1785_s27, 256  ;;  %p1787_p1 = scmp.lt.s32.totalorder %s299_s10, %s1785_s27 }
  0x30   : > { %p1782_p0 = pnand %p1780_p9, %p2058_p2  ;;  %p1788_p3 = scmp.lt.s32.totalorder %s1786_s8, %s1779_s22 }
  0x32   : > { %p1783_p12 = pneg %p1782_p0  ;;  %p1789_p11 = por %p1788_p3, %p1787_p1 }
  0x34   : > { %p1790_p6 = pnand %p1789_p11, %p1783_p12 }
  0x36   : > { %1793 = shalt.err (!%p1790_p6)
}
  0x37   : > { %1700 = dma.hbm_to_vmem [thread:$0]  (!%p2039_p13), %s2048_s25, 128, %s299_s10, %s2052_s12  }
  0x38   : > { %p321_p9 = scmp.lt.s32.totalorder %s1918_s30, 3  ;;  %s2380_s0 = sld [smem:[#allocation17_spill]] }
  0x39   : > { %p2381_p0 = scmp.ge.s32.totalorder %s1918_s30, 1  ;;  %s273_s17 = scalar_lea.vmem [#allocation2], %s2037_s20 }
  0x3a   : > { %s280_s13 = sshll.u32 %s273_s17, 4  ;;  %s2383_s23 = sand.u32 1, %s1914_s29   ;;  %s281_s13 = int_to_ptr.vmem [resolvable:$true] %s280_s13 }
  0x3b   : > { %p2086_p6 = pnand %p2381_p0, %p321_p9  ;;  %s270_s24 = scalar_lea.sflag [#allocation3], %s2383_s23 }
  0x3d   : > { %s2382_s8 = scalar_select %p2086_p6, 1, 0 }
  0x3e   : > { %s2082_s27 = scalar_lea.hbm %s2380_s0, %s2033_s19  ;;  %s1799_s22 = scalar_lea.hbm %s2380_s0, 256 }
  0x3f   : > { %s1794_s25 = scalar_lea.hbm %s2082_s27, 128  ;;  %p1800_p5 = scmp.lt.s32.totalorder %s2082_s27, %s2380_s0 }
  0x40   : > { %p1795_p11 = scmp.ne.s32.totalorder %s2082_s27, %s1794_s25  ;;  %p1801_p7 = scmp.lt.s32.totalorder %s1799_s22, %s1794_s25 }
  0x42   : > { %p1797_p12 = pnand %p1795_p11, %p2058_p2  ;;  %p1802_p8 = por %p1801_p7, %p1800_p5 }
  0x44   : > { %p1798_p4 = pneg %p1797_p12 }
  0x46   : > { %p1803_p10 = pnand %p1802_p8, %p1798_p4 }
  0x48   : > { %1806 = shalt.err (!%p1803_p10)
}
  0x49   : > { %s1807_s17 = scalar_lea.vmem %s281_s13, 128  ;;  %s1921_s23 = smov [#allocation2]  }
  0x4a   : > { %p1808_p1 = scmp.ne.s32.totalorder %s281_s13, %s1807_s17  ;;  %s1812_s1 = sshll.u32 %s1921_s23, 4  ;;  %s1813_s1 = int_to_ptr.vmem [resolvable:$false] %s1812_s1 }
  0x4b   : > { %s1814_s29 = scalar_lea.vmem %s1813_s1, 256  ;;  %p1815_p0 = scmp.lt.s32.totalorder %s281_s13, %s1813_s1 }
  0x4c   : > { %p1810_p3 = pnand %p1808_p1, %p2058_p2  ;;  %p1816_p11 = scmp.lt.s32.totalorder %s1814_s29, %s1807_s17 }
  0x4e   : > { %p1811_p9 = pneg %p1810_p3  ;;  %p1817_p12 = por %p1816_p11, %p1815_p0 }
  0x50   : > { %p1818_p6 = pnand %p1817_p12, %p1811_p9 }
  0x52   : > { %1821 = shalt.err (!%p1818_p6)
}
  0x53   : > { %1697 = dma.hbm_to_vmem [thread:$0]  (!%p2039_p13), %s2082_s27, 128, %s281_s13, %s270_s24  }
  0x54   : > { %s314_s26 = scalar_lea.hbm %s2350_s2, %s2033_s19  ;;  %s309_s22 = scalar_lea.vmem [#allocation7], %s2037_s20 }
  0x55   : > { %s316_s11 = sshll.u32 %s309_s22, 4  ;;  %s1822_s14 = scalar_lea.hbm %s314_s26, 128  ;;  %s317_s11 = int_to_ptr.vmem [resolvable:$true] %s316_s11 }
  0x56   : > { %p1823_p4 = scmp.ne.s32.totalorder %s314_s26, %s1822_s14  ;;  %s1827_s17 = scalar_lea.hbm %s2350_s2, 256 }
  0x57   : > { %p1828_p6 = scmp.lt.s32.totalorder %s314_s26, %s2350_s2  ;;  %p1829_p8 = scmp.lt.s32.totalorder %s1827_s17, %s1822_s14 }
  0x58   : > { %p1825_p5 = pnand %p1823_p4, %p2058_p2 }
  0x59   : > { %p1830_p10 = por %p1829_p8, %p1828_p6 }
  0x5a   : > { %p1826_p7 = pneg %p1825_p5 }
  0x5c   : > { %p1831_p1 = pnand %p1830_p10, %p1826_p7 }
  0x5e   : > { %1834 = shalt.err (!%p1831_p1)
}
  0x5f   : > { %s1835_s19 = scalar_lea.vmem %s317_s11, 128  ;;  %s1922_s20 = smov [#allocation7]  }
  0x60   : > { %p1836_p3 = scmp.ne.s32.totalorder %s317_s11, %s1835_s19  ;;  %s1840_s27 = sshll.u32 %s1922_s20, 4  ;;  %s1841_s27 = int_to_ptr.vmem [resolvable:$false] %s1840_s27 }
  0x61   : > { %s1842_s13 = scalar_lea.vmem %s1841_s27, 256  ;;  %p1843_p11 = scmp.lt.s32.totalorder %s317_s11, %s1841_s27 }
  0x62   : > { %p1838_p9 = pnand %p1836_p3, %p2058_p2  ;;  %p1844_p12 = scmp.lt.s32.totalorder %s1842_s13, %s1835_s19 }
  0x64   : > { %p1839_p0 = pneg %p1838_p9  ;;  %p1845_p4 = por %p1844_p12, %p1843_p11 }
  0x66   : > { %p1846_p5 = pnand %p1845_p4, %p1839_p0 }
  0x68   : > { %1849 = shalt.err (!%p1846_p5)
}
  0x69   : > { %1703 = dma.hbm_to_vmem [thread:$0]  (!%p2039_p13), %s314_s26, 128, %s317_s11, %s2052_s12  }
  0x6a   : > { %p2384_p7 = scmp.ne.s32.totalorder %s2382_s8, 0 }
  0x6b   : > { %s2130_s0 = sand.u32 (!%p2384_p7), 1, %s1910_s28   ;;  %p2385_p2 = scmp.ne.s32.totalorder (!%p2384_p7), %s2373_s15, 0 }
  0x6c   : > { %325 = sbr.rel (%p2384_p7) target bundleno = 1478 (0x5c6), region = 52  ;;  %s2133_s18 = sshll.u32 (!%p2384_p7), %s2130_s0, 3 }
  0x6d   : > { %s328_s24 = scalar_lea.sflag (!%p2384_p7), [#allocation3], %s2130_s0  ;;  %s331_s25 = scalar_lea.vmem (!%p2384_p7), [#allocation2], %s2133_s18 }
  0x71   : > { %1893 = dma.done.wait (%p2385_p2), %s328_s24, 128  }
  0x72   : > { %1895 = vsyncadd (%p2385_p2), %s328_s24, 4294967168  ;;  %s336_s21 = sand.u32 1, %s1998_s9   ;;  %s340_s8 = scalar_lea.vmem [#allocation5], %s2133_s18 }
  0x73   : > { %s337_s12 = scalar_lea.sflag [#allocation6], %s336_s21 }
  0x74   : > { %1897 = dma.done.wait (%p2385_p2), %s337_s12, 256  }
  0x75   : > { %1899 = vsyncadd (%p2385_p2), %s337_s12, 4294967040  ;;  %v1923_v0 = vmov 0.0   ;;  %vm1924_vm0 = vmmov 0   ;;  %v398_v1 = vld [vmem:[%s2351_s3 + $0x18] sm:$0xff]  ;;  %v397_v2 = vld [vmem:[%s2351_s3 + $0x10] sm:$0xff]  ;;  %vm399_vm1 = vcmask 261120  }
  0x76   : > { %1594 = vmatprep.subr.mxu1 %v1923_v0  ;;  %1602 = vmatprep.mubr.msk.f32.mxu1 %vm1924_vm0, %v1923_v0  ;;  %v396_v3 = vld [vmem:[%s2351_s3 + $0x8] sm:$0xff]  ;;  %v395_v4 = vld [vmem:[%s2351_s3] sm:$0xff]  ;;  %v476_v6 = vld [vmem:[%s2352_s4 + $0x18] sm:$0xff]  ;;  %s349_s14 = scalar_lea.vmem [#allocation7], %s2133_s18  ;;  %vm628_vm2 = vcmask 130048   ;;  %s1925_s1 = smov 96  }
  0x77   : > { %1616 = vmatprep.subr.mxu0 %v1923_v0  ;;  %1624 = vmatprep.mubr.msk.f32.mxu0 %vm1924_vm0, %v1923_v0  ;;  %v392_v5 = vld [vmem:[%s331_s25] sm:$0xff]  ;;  %v475_v7 = vld [vmem:[%s2352_s4 + $0x10] sm:$0xff]  ;;  %v553_v11 = vld [vmem:[%s2353_s5 + $0x18] sm:$0xff]  ;;  %s1926_s29 = smov 112   ;;  %s1927_s17 = smov 80   ;;  %vm705_vm3 = vcmask 64512  }
  0x78   : > { %1595 = vmatpush3.msra.mxu1 %v398_v1  ;;  %v474_v8 = vld [vmem:[%s2352_s4 + $0x8] sm:$0xff]  ;;  %v473_v9 = vld [vmem:[%s2352_s4] sm:$0xff]  ;;  %v393_v10 = vld [vmem:[%s340_s8] sm:$0xff]  ;;  %1617 = vmatpush3.msra.mxu0 %v553_v11  ;;  %vm1300_vm4 = vcmask 392192   ;;  %vm1317_vm5 = vcmask 523264   ;;  %s1551_s20 = sshll.u32 %s1998_s9, 7 }
  0x79   : > { %1596 = vmatprep.subr.mxu1 %v1923_v0  ;;  %v552_v12 = vld [vmem:[%s2353_s5 + $0x10] sm:$0xff]  ;;  %1618 = vmatprep.subr.mxu0 %v1923_v0  ;;  %v551_v13 = vld [vmem:[%s2353_s5 + $0x8] sm:$0xff]  ;;  %v550_v14 = vld [vmem:[%s2353_s5] sm:$0xff]  ;;  %s391_s27 = scalar_lea.vmem [#allocation8], %s2133_s18  ;;  %s2386_s21 = sld [smem:[#allocation19_spill]] }
  0x7a   : > { %1597 = vmatpush3.msra.mxu1 %v397_v2  ;;  %1619 = vmatpush3.msra.mxu0 %v552_v12  ;;  %v394_v15 = vld [vmem:[%s349_s14] sm:$0xff]  ;;  %s1406_s13 = sshll.u32 %s391_s27, 4  ;;  %s1393_s10 = scalar_lea.sflag [#allocation4], %s2130_s0  ;;  %s1407_s13 = int_to_ptr.vmem [resolvable:$true] %s1406_s13 }
  0x7b   : > { %1598 = vmatprep.subr.mxu1 %v1923_v0  ;;  %1620 = vmatprep.subr.mxu0 %v1923_v0  ;;  %s1850_s26 = scalar_lea.vmem %s1407_s13, 128  ;;  %p2387_p6 = scmp.ne.s32.totalorder %s2374_s16, 0 }
  0x7c   : > { %1599 = vmatpush3.msra.mxu1 %v396_v3  ;;  %1621 = vmatpush3.msra.mxu0 %v551_v13  ;;  %v1309_v13 = vld [vmem:[%s2354_s6 + $0x38] sm:$0xff]  ;;  %p1851_p13 = scmp.ne.s32.totalorder %s1407_s13, %s1850_s26  ;;  %s1931_s9 = smov [#allocation8]  }
  0x7d   : > { %1600 = vmatprep.subr.mxu1 %v1923_v0  ;;  %1622 = vmatprep.subr.mxu0 %v1923_v0  ;;  %s1854_s18 = sshll.u32 %s1931_s9, 4  ;;  %s1855_s18 = int_to_ptr.vmem [resolvable:$false] %s1854_s18 }
  0x7e   : > { %1601 = vmatpush3.msra.mxu1 %v395_v4  ;;  %1623 = vmatpush3.msra.mxu0 %v550_v14  ;;  %v1308_v14 = vld [vmem:[%s2354_s6 + $0x30] sm:$0xff]  ;;  %p1852_p8 = pnand %p1851_p13, %p2387_p6  ;;  %s1856_s8 = scalar_lea.vmem %s1855_s18, 256 }
  0x7f   : > { %1603 = vmatmul.mubr.msk.f32.vlgmr.msra.gmra.mxu1 %vm399_vm1, %v392_v5  ;;  %1605 = vmatprep.subr.mxu1 %v1923_v0  ;;  %s2310_s12 = scalar_lea.hbm %s2386_s21, %s1551_s20  ;;  %p1857_p1 = scmp.lt.s32.totalorder %s1407_s13, %s1855_s18 }
  0x80   : > { %1606 = vmatpush3.msra.mxu1 %v476_v6  ;;  %1613 = vmatprep.mubr.msk.f32.mxu1 %vm1924_vm0, %v1923_v0  ;;  %p1853_p10 = pneg %p1852_p8  ;;  %p1858_p3 = scmp.lt.s32.totalorder %s1856_s8, %s1850_s26 }
  0x81   : > { %1607 = vmatprep.subr.mxu1 %v1923_v0  ;;  %1625 = vmatmul.mubr.msk.f32.vlgmr.msra.gmra.mxu0 %vm399_vm1, %v394_v15  ;;  %v1307_v15 = vld [vmem:[%s2354_s6 + $0x28] sm:$0xff] }
  0x82   : > { %1608 = vmatpush3.msra.mxu1 %v475_v7  ;;  %1637 = vmatprep.subr.mxu0 %v1923_v0  ;;  %p1859_p9 = por %p1858_p3, %p1857_p1 }
  0x83   : > { %1609 = vmatprep.subr.mxu1 %v1923_v0  ;;  %1639 = vmatprep.mubr.msk.f32.mxu0 %vm1924_vm0, %v1923_v0 }
  0x84   : > { %1610 = vmatpush3.msra.mxu1 %v474_v8  ;;  %p1860_p0 = pnand %p1859_p9, %p1853_p10 }
  0x85   : > { %1611 = vmatprep.subr.mxu1 %v1923_v0 }
  0x86   : > { %1612 = vmatpush3.msra.mxu1 %v473_v9 }
  0x87   : > { %1614 = vmatmul.mubr.msk.f32.vlgmr.msra.gmra.mxu1 %vm399_vm1, %v393_v10  ;;  %1627 = vmatprep.subr.mxu1 %v1923_v0 }
  0x88   : > { %1629 = vmatprep.mubr.msk.f32.mxu1 %vm1924_vm0, %v1923_v0 }
 0x13f   : > { %v469_v16 = vpop.f32.mrf.mxu1 }
 0x140   : > { %v627_v20 = vmul.f32 0.25, %v469_v16 }
 0x141   : > { %v1604_v17 = vpop.f32.mrf.mxu1  ;;  %v2224_v21 = vpop.f32.mrf.mxu0 }
 0x143   : > { %v1626_v22 = vpop.f32.mrf.mxu0 }
 0x144   : > { %v1302_v22 = vld [vmem:[%s2354_s6] sm:$0xff] }
 0x147   : > { %v546_v18 = vpop.f32.mrf.mxu1 }
 0x148   : > { %958 = vrot.lane.b32.xlu1 %v546_v18, %s1925_s1  ;;  %792 = vrot.lane.b32.xlu0 %v546_v18, %s1926_s29 }
 0x149   : > { %1628 = vmatpush3.xpose.msk.msra.mxu1 %vm628_vm2, %v546_v18  ;;  %v1615_v19 = vpop.f32.mrf.mxu1 }
 0x14a   : > { %1632 = vmatprep.subr.mxu1 %v1923_v0  ;;  %v1305_v19 = vld [vmem:[%s2354_s6 + $0x18] sm:$0xff] }
 0x14c   : > { %1630 = vmatmul.mubr.msk.f32.vlgmr.msra.gmra.mxu1 %vm628_vm2, %v627_v20  ;;  %956 = vrot.lane.b32.xlu1 %v627_v20, %s1925_s1 }
 0x14d   : > { %790 = vrot.lane.b32.xlu0 %v627_v20, %s1926_s29  ;;  %1634 = vmatprep.mubr.msk.f32.mxu1 %vm1924_vm0, %v1923_v0 }
 0x14e   : > { %1633 = vmatpush3.msra.mxu1 %v2224_v21 }
 0x14f   : > { %1642 = vmatprep.subr.mxu1 %v1923_v0 }
 0x150   : > { %1121 = vrot.lane.b32.xlu1 %v627_v20, %s1927_s17  ;;  %v1304_v20 = vld [vmem:[%s2354_s6 + $0x10] sm:$0xff] }
 0x151   : > { %1123 = vrot.lane.b32.xlu0 %v546_v18, %s1927_s17  ;;  %v1306_v18 = vld [vmem:[%s2354_s6 + $0x20] sm:$0xff] }
 0x1ba   : > { %v793_v23 = vpop.permute.xlu0 %792  ;;  %v959_v24 = vpop.permute.xlu1 %958 }
 0x1bb   : > { %1638 = vmatpush3.xpose.msk.msra.mxu0 %vm628_vm2, %v793_v23 }
 0x1bc   : > { %1647 = vmatprep.subr.mxu0 %v1923_v0 }
 0x1be   : > { %v957_v26 = vpop.permute.xlu1 %956 }
 0x1bf   : > { %v791_v25 = vpop.permute.xlu0 %790 }
 0x1c0   : > { %1640 = vmatmul.mubr.msk.f32.vlgmr.msra.gmra.mxu0 %vm628_vm2, %v791_v25 }
 0x1c1   : > { %1648 = vmatpush3.xpose.msk.msra.mxu0 %vm628_vm2, %v959_v24  ;;  %1649 = vmatprep.mubr.msk.f32.mxu0 %vm1924_vm0, %v1923_v0 }
 0x1c2   : > { %1657 = vmatprep.subr.mxu0 %v1923_v0  ;;  %v1122_v28 = vpop.permute.xlu1 %1121 }
 0x1c3   : > { %v1124_v27 = vpop.permute.xlu0 %1123 }
 0x1c4   : > { %1650 = vmatmul.mubr.msk.f32.vlgmr.msra.gmra.mxu0 %vm628_vm2, %v957_v26 }
 0x1c5   : > { %1658 = vmatpush3.xpose.msk.msra.mxu0 %vm628_vm2, %v1124_v27  ;;  %1659 = vmatprep.mubr.msk.f32.mxu0 %vm1924_vm0, %v1923_v0 }
 0x1c6   : > { %1667 = vmatprep.subr.mxu0 %v1923_v0 }
 0x1c8   : > { %1660 = vmatmul.mubr.msk.f32.vlgmr.msra.gmra.mxu0 %vm628_vm2, %v1122_v28 }
 0x1c9   : > { %1683 = vmatprep.mubr.msk.f32.mxu0 %vm1924_vm0, %v1923_v0  ;;  %1668 = vmatpush3.msra.mxu0 %v1309_v13 }
 0x1ca   : > { %1669 = vmatprep.subr.mxu0 %v1923_v0 }
 0x1cb   : > { %1670 = vmatpush3.msra.mxu0 %v1308_v14 }
 0x1cc   : > { %1671 = vmatprep.subr.mxu0 %v1923_v0 }
 0x1cd   : > { %1672 = vmatpush3.msra.mxu0 %v1307_v15 }
 0x1ce   : > { %1673 = vmatprep.subr.mxu0 %v1923_v0 }
 0x1cf   : > { %1674 = vmatpush3.msra.mxu0 %v1306_v18 }
 0x1d0   : > { %1675 = vmatprep.subr.mxu0 %v1923_v0 }
 0x1d1   : > { %1676 = vmatpush3.msra.mxu0 %v1305_v19 }
 0x1d2   : > { %1677 = vmatprep.subr.mxu0 %v1923_v0 }
 0x1d3   : > { %1678 = vmatpush3.msra.mxu0 %v1304_v20 }
 0x1d4   : > { %1679 = vmatprep.subr.mxu0 %v1923_v0 }
 0x20c   : > { %v701_v29 = vpop.f32.mrf.mxu1 }
 0x20d   : > { %v706_v30 = vsel %vm705_vm3, %v701_v29, -inf }
 0x20e   : > { %707 = vmax.xlane.f32.xlu0 %v706_v30  ;;  %v1631_v31 = vpop.f32.mrf.mxu1 }
 0x280   : > { %v864_v32 = vpop.f32.mrf.mxu0 }
 0x281   : > { %v868_v33 = vsel %vm705_vm3, %v864_v32, -inf }
 0x282   : > { %869 = vmax.xlane.f32.xlu1 %v868_v33  ;;  %v1641_v34 = vpop.f32.mrf.mxu0 }
 0x283   : > { %v1548_v34 = vld [vmem:[%s2355_s7] ss:$0 sm:$0xff] }
 0x284   : > { %v1030_v35 = vpop.f32.mrf.mxu0 }
 0x285   : > { %v1034_v36 = vsel %vm705_vm3, %v1030_v35, -inf }
 0x286   : > { %v1651_v37 = vpop.f32.mrf.mxu0  ;;  %1035 = vmax.xlane.f32.xlu0 %v1034_v36 }
 0x288   : > { %v1195_v38 = vpop.f32.mrf.mxu0 }
 0x289   : > { %v1199_v39 = vsel %vm705_vm3, %v1195_v38, -inf }
 0x28a   : > { %v1661_v40 = vpop.f32.mrf.mxu0  ;;  %1200 = vmax.xlane.f32.xlu0 %v1199_v39 }
 0x293   : > { %880 = vrot.lane.b32.xlu1 %v2224_v21, %s1926_s29  ;;  %s1929_s29 = smov 32  }
 0x297   : > { %v708_v41 = vpop.xlane.xlu0 %707 }
 0x298   : > { %v709_v42 = vsub.f32 %v701_v29, %v708_v41 }
 0x29a   : > { %v710_v43 = vmul.f32 1.442695, %v709_v42 }
 0x29c   : > { %1750 = vpow2.f32 %v710_v43 }
 0x2a9   : > { %v1751_v44 = vpop.eup %1750 }
 0x2aa   : > { %v712_v45 = vsel %vm705_vm3, %v1751_v44, 0.0 }
 0x2b7   : > { %713 = vadd.xlane.f32.xlu1 %v712_v45 }
 0x30b   : > { %v870_v46 = vpop.xlane.xlu1 %869 }
 0x30c   : > { %v871_v47 = vsub.f32 %v864_v32, %v870_v46 }
 0x30e   : > { %v872_v48 = vmul.f32 1.442695, %v871_v47 }
 0x30f   : > { %v1036_v49 = vpop.xlane.xlu0 %1035  ;;  %v881_v61 = vpop.permute.xlu1 %880 }
 0x310   : > { %1752 = vpow2.f32 %v872_v48  ;;  %v1037_v50 = vsub.f32 %v1030_v35, %v1036_v49 }
 0x312   : > { %v1038_v51 = vmul.f32 1.442695, %v1037_v50 }
 0x313   : > { %v1201_v52 = vpop.xlane.xlu0 %1200 }
 0x314   : > { %1754 = vpow2.f32 %v1038_v51  ;;  %v1202_v53 = vsub.f32 %v1195_v38, %v1201_v52 }
 0x316   : > { %v1203_v54 = vmul.f32 1.442695, %v1202_v53 }
 0x318   : > { %1756 = vpow2.f32 %v1203_v54 }
 0x31d   : > { %v1753_v55 = vpop.eup %1752 }
 0x31e   : > { %v874_v56 = vsel %vm705_vm3, %v1753_v55, 0.0 }
 0x31f   : > { %875 = vadd.xlane.f32.xlu0 %v874_v56 }
 0x321   : > { %v1755_v57 = vpop.eup %1754 }
 0x322   : > { %v1040_v58 = vsel %vm705_vm3, %v1755_v57, 0.0 }
 0x323   : > { %1041 = vadd.xlane.f32.xlu1 %v1040_v58 }
 0x325   : > { %v1757_v59 = vpop.eup %1756 }
 0x326   : > { %v1205_v60 = vsel %vm705_vm3, %v1757_v59, 0.0 }
 0x327   : > { %1206 = vadd.xlane.f32.xlu0 %v1205_v60 }
 0x334   : > { %1210 = vrot.lane.b32.xlu1 %v2224_v21, %s1927_s17  ;;  %s1930_s17 = smov 48  }
 0x33d   : > { %1045 = vrot.lane.b32.xlu0 %v2224_v21, %s1925_s1  ;;  %v1303_v21 = vld [vmem:[%s2354_s6 + $0x8] sm:$0xff]  ;;  %s1928_s1 = smov 16  }
 0x33e   : > { %1680 = vmatpush3.msra.mxu0 %v1303_v21 }
 0x33f   : > { %1681 = vmatprep.subr.mxu0 %v1923_v0 }
 0x340   : > { %v714_v62 = vpop.xlane.xlu1 %713  ;;  %1682 = vmatpush3.msra.mxu0 %v1302_v22 }
 0x341   : > { %1758 = vrcp.f32 %v714_v62 }
 0x34e   : > { %v1759_v63 = vpop.eup %1758 }
 0x34f   : > { %v716_v1 = vmul.f32 %v1759_v63, %v1751_v44 }
 0x351   : > { %1635 = vmatmul.mubr.msk.f32.vlgmr.msra.gmra.mxu1 %vm705_vm3, %v716_v1 }
 0x352   : > { %1643 = vmatpush3.msra.mxu1 %v881_v61  ;;  %1644 = vmatprep.mubr.msk.f32.mxu1 %vm1924_vm0, %v1923_v0 }
 0x353   : > { %1652 = vmatprep.subr.mxu1 %v1923_v0 }
 0x3a8   : > { %v876_v2 = vpop.xlane.xlu0 %875 }
 0x3a9   : > { %1760 = vrcp.f32 %v876_v2 }
 0x3ac   : > { %v1042_v3 = vpop.xlane.xlu1 %1041 }
 0x3ad   : > { %1762 = vrcp.f32 %v1042_v3 }
 0x3b0   : > { %v1207_v4 = vpop.xlane.xlu0 %1206  ;;  %v1211_v10 = vpop.permute.xlu1 %1210 }
 0x3b1   : > { %1764 = vrcp.f32 %v1207_v4 }
 0x3b4   : > { %v1046_v7 = vpop.permute.xlu0 %1045 }
 0x3b6   : > { %v1761_v5 = vpop.eup %1760 }
 0x3b7   : > { %v878_v6 = vmul.f32 %v1761_v5, %v1753_v55 }
 0x3b9   : > { %1645 = vmatmul.mubr.msk.f32.vlgmr.msra.gmra.mxu1 %vm705_vm3, %v878_v6 }
 0x3ba   : > { %v1763_v8 = vpop.eup %1762  ;;  %1653 = vmatpush3.msra.mxu1 %v1046_v7  ;;  %1654 = vmatprep.mubr.msk.f32.mxu1 %vm1924_vm0, %v1923_v0 }
 0x3bb   : > { %1662 = vmatprep.subr.mxu1 %v1923_v0  ;;  %v1044_v9 = vmul.f32 %v1763_v8, %v1755_v57 }
 0x3bd   : > { %1655 = vmatmul.mubr.msk.f32.vlgmr.msra.gmra.mxu1 %vm705_vm3, %v1044_v9 }
 0x3be   : > { %v1765_v11 = vpop.eup %1764  ;;  %1663 = vmatpush3.msra.mxu1 %v1211_v10  ;;  %1664 = vmatprep.mubr.msk.f32.mxu1 %vm1924_vm0, %v1923_v0 }
 0x3bf   : > { %v1209_v12 = vmul.f32 %v1765_v11, %v1757_v59 }
 0x3c1   : > { %1665 = vmatmul.mubr.msk.f32.vlgmr.msra.gmra.mxu1 %vm705_vm3, %v1209_v12 }
 0x411   : > { %v786_v16 = vpop.f32.mrf.mxu1 }
 0x413   : > { %v1636_v17 = vpop.f32.mrf.mxu1 }
 0x479   : > { %v952_v23 = vpop.f32.mrf.mxu1 }
 0x47a   : > { %1287 = vrot.lane.b32.xlu1 %v952_v23, %s1928_s1 }
 0x47b   : > { %v1646_v24 = vpop.f32.mrf.mxu1 }
 0x47d   : > { %v1117_v25 = vpop.f32.mrf.mxu1 }
 0x47e   : > { %1291 = vrot.lane.b32.xlu0 %v1117_v25, %s1929_s29 }
 0x47f   : > { %v1656_v26 = vpop.f32.mrf.mxu1 }
 0x481   : > { %v1282_v27 = vpop.f32.mrf.mxu1 }
 0x482   : > { %1295 = vrot.lane.b32.xlu1 %v1282_v27, %s1930_s17 }
 0x483   : > { %v1666_v28 = vpop.f32.mrf.mxu1 }
 0x4ec   : > { %v1288_v0 = vpop.permute.xlu1 %1287 }
 0x4ed   : > { %v1298_v30 = vsel %vm628_vm2, %v786_v16, %v1288_v0 }
 0x4f0   : > { %v1292_v29 = vpop.permute.xlu0 %1291 }
 0x4f1   : > { %v1299_v31 = vsel %vm399_vm1, %v1298_v30, %v1292_v29 }
 0x4f4   : > { %v1296_v32 = vpop.permute.xlu1 %1295 }
 0x4f5   : > { %v1301_v33 = vsel %vm1300_vm4, %v1299_v31, %v1296_v32 }
 0x4f6   : > { %1684 = vmatmul.mubr.msk.f32.vlgmr.msra.gmra.mxu0 %vm1317_vm5, %v1301_v33 }
 0x5b6   : > { %v1387_v35 = vpop.f32.mrf.mxu0 }
 0x5b7   : > { %v1388_v36 = vadd.f32 %v1548_v34, %v1387_v35 }
 0x5b8   : > { %v1685_v37 = vpop.f32.mrf.mxu0 }
 0x5b9   : > { %1391 = vst.msk [vmem:[%s391_s27] sm:$0xff] %vm399_vm1, %v1388_v36 }
 0x5ba   : > { %1863 = shalt.err (!%p1860_p0)
}
 0x5bb   : > { %s1864_s22 = scalar_lea.hbm %s2310_s12, 128  ;;  %s1868_s15 = scalar_lea.hbm %s2386_s21, 256 }
 0x5bc   : > { %p1865_p11 = scmp.ne.s32.totalorder %s2310_s12, %s1864_s22  ;;  %p1869_p5 = scmp.lt.s32.totalorder %s2310_s12, %s2386_s21 }
 0x5bd   : > { %p1870_p7 = scmp.lt.s32.totalorder %s1868_s15, %s1864_s22 }
 0x5be   : > { %p1866_p12 = pnand %p1865_p11, %p2387_p6 }
 0x5bf   : > { %p1871_p2 = por %p1870_p7, %p1869_p5 }
 0x5c0   : > { %p1867_p4 = pneg %p1866_p12 }
 0x5c2   : > { %p1872_p13 = pnand %p1871_p2, %p1867_p4 }
 0x5c4   : > { %1875 = shalt.err (!%p1872_p13)
}
 0x5c5   : > { %1692 = dma.vmem_to_hbm [thread:$0]  (%p2387_p6), %s1407_s13, 128, %s2310_s12, %s1393_s10  }
 0x5c6 PF: > { %s2388_s29 = sld [smem:[#allocation12_spill]]  ;;  %p2391_p10 = scmp.ge.s32.totalorder %s1918_s30, 2 }
 0x5c7   : > { %s2389_s17 = sld [smem:[#allocation16_spill]] }
 0x5cc   : > { %s1418_s23 = sand.u32 1, %s2388_s29  }
 0x5cd   : > { %p2390_p8 = scmp.ne.s32.totalorder %s2389_s17, 0  ;;  %s1419_s19 = scalar_lea.sflag [#allocation4], %s1418_s23 }
 0x5cf   : > { %p1705_p1 = pnand %p2391_p10, %p2390_p8 }
 0x5d1   : > { %p1706_p3 = pneg %p1705_p1 }
 0x5d3   : > { %1901 = dma.done.wait (%p1706_p3), %s1419_s19, 128  }
 0x5d4   : > { %1903 = vsyncadd (%p1706_p3), %s1419_s19, 4294967168  ;;  %s2392_s30 = sld [smem:[#allocation14_spill]]  ;;  %s2395_s27 = smov %s1910_s28 }
 0x5d5   : > { %s2393_s20 = sld [smem:[#allocation13_spill]] }
 0x5d6   : > { %s2394_s29 = sld [smem:[#allocation15_spill]] }
 0x5da   : > { %p24_p9 = scmp.ge.s32.totalorder %s2392_s30, 4  }
 0x5db   : > { %s2396_s28 = smov %s2393_s20 }
 0x5dc   :  { %26 = sbr.rel (!%p24_p9) target bundleno = 11 (0xb), region = 121 }
 0x5e1   :  { %1424 = vsyncpa [#allocation3], 1 }
 0x5e2   :  { %1426 = vsyncpa [#allocation3 + $0x1], 1 }
 0x5e3   :  { %1427 = vsyncpa [#allocation6], 1 }
 0x5e4   :  { %1429 = vsyncpa [#allocation6 + $0x1], 1 }
 0x5e5   :  { %1430 = vsyncpa [#allocation4], 1 }
 0x5e6   :  { %1432 = vsyncpa [#allocation4 + $0x1], 1 }

</bundles_post_ra>
